<compile_context>
chip_gen: v5e
topology: v5e:2x2
jax: 0.10.0
libtpu: 0.0.40
codegen_flags: <defaults>
</compile_context>

<pallas_src>
import functools

import jax
import jax.numpy as jnp
from jax.experimental import pallas as pl
from jax.experimental.pallas import tpu as pltpu


def _cw_loss_kernel(x_ref, t_ref, out_ref, *, n_rows, tile_n):
    i = pl.program_id(0)

    x = x_ref[...]                                   # [tile_n, C], native dtype
    t = t_ref[...]                                   # [tile_n, 1], int32

    class_ids = jax.lax.broadcasted_iota(jnp.int32, x.shape, dimension=1)
    is_target = class_ids == t                       # [tile_n, C] bool

    zero = jnp.zeros((), dtype=x.dtype)              # dtype-matched: no re-promotion
    # Correct logit: exact even in bf16 (single nonzero per row).
    correct = jnp.sum(jnp.where(is_target, x, zero), axis=1,
                      keepdims=True).astype(jnp.float32)
    # "Wrong" logit: max with 0 substituted at the target position — exactly
    # max((1 - one_hot) * x) as in the PyTorch reference (max is exact in any dtype).
    wrong = jnp.max(jnp.where(is_target, zero, x), axis=1,
                    keepdims=True).astype(jnp.float32)

    per_sample = jnp.maximum(correct - wrong + 50.0, 0.0)      # [tile_n, 1] f32

    # Mask padded rows of the (possibly ragged) last tile.
    row_ids = i * tile_n + jax.lax.broadcasted_iota(
        jnp.int32, per_sample.shape, dimension=0)
    per_sample = jnp.where(row_ids < n_rows, per_sample, 0.0)

    partial = jnp.sum(per_sample)                    # one sublane reduce per tile

    # Store the partial at [0,0,0] of this tile's private (1,8,128) block;
    # everything else is 0 so the wrapper can simply sum the whole output.
    sub = jax.lax.broadcasted_iota(jnp.int32, (1, 8, 128), dimension=1)
    lane = jax.lax.broadcasted_iota(jnp.int32, (1, 8, 128), dimension=2)
    out_ref[...] = jnp.where((sub == 0) & (lane == 0), partial, 0.0)


def _vmem_capacity_bytes() -> int:
    try:
        return int(pltpu.get_tpu_info().vmem_capacity_bytes)
    except Exception:
        return 64 * 1024 * 1024          # conservative fallback (v7x has the least)


def _sublane_pack(itemsize: int) -> int:
    # Rows per packed sublane group: f32 -> 8, bf16/f16 -> 16, int8/fp8 -> 32.
    return 8 * max(1, 4 // max(1, itemsize))


def _per_row_vmem_bytes(c: int, itemsize: int) -> int:
    """Conservative per-batch-row VMEM footprint, including lane padding."""
    c_pad = pl.cdiv(c, 128) * 128          # last dim is lane-padded to 128
    b = 2 * c_pad * itemsize               # logits tile, double-buffered by the pipeline
    b += 2 * c_pad * itemsize              # native-dtype where/select temporaries
    b += 4 * c_pad                         # i32 iota / compare temporary
    b += 2 * 128 * 4                       # label column (lane-padded i32), double-buffered
    b += 4 * 128 * 4                       # f32 per-row columns (correct/wrong/relu/rowids)
    return b


def _choose_tile_n(n: int, c: int, itemsize: int, pack: int, budget_bytes: int) -> int:
    per_row = _per_row_vmem_bytes(c, itemsize)
    rows = budget_bytes // per_row
    rows = max(pack, (rows // pack) * pack)
    return n if rows >= n else int(rows)


def carlini_wagner_loss(x: jax.Array, target: jax.Array,
                        tile_rows: int | None = None) -> jax.Array:
    """x: [N, C] logits (any float dtype), target: [N] int labels. Returns f32 scalar."""
    n, c = x.shape
    t2d = target.astype(jnp.int32).reshape(n, 1)
    itemsize = jnp.dtype(x.dtype).itemsize
    pack = _sublane_pack(itemsize)

    vmem_capacity = _vmem_capacity_bytes()
    budget = min(vmem_capacity // 4, 24 * 1024 * 1024)   # total working-set budget

    if tile_rows is None:
        tile_n = _choose_tile_n(n, c, itemsize, pack, budget)
    else:
        tile_n = n if tile_rows >= n else max(pack, (tile_rows // pack) * pack)
    num_tiles = pl.cdiv(n, tile_n)

    # vmem_limit = estimated need with headroom; never the whole physical VMEM.
    working_set = _per_row_vmem_bytes(c, itemsize) * tile_n + (1 << 20)
    vmem_limit = int(min(max(2 * working_set, 16 << 20), (3 * vmem_capacity) // 4))

    kernel = functools.partial(_cw_loss_kernel, n_rows=n, tile_n=tile_n)

    partials = pl.pallas_call(
        kernel,
        out_shape=jax.ShapeDtypeStruct((num_tiles, 8, 128), jnp.float32),
        grid_spec=pltpu.PrefetchScalarGridSpec(
            num_scalar_prefetch=0,
            grid=(num_tiles,),
            in_specs=[
                pl.BlockSpec((tile_n, c), lambda i: (i, 0)),   # logits tile
                pl.BlockSpec((tile_n, 1), lambda i: (i, 0)),   # label column tile
            ],
            out_specs=pl.BlockSpec((1, 8, 128), lambda i: (i, 0, 0)),
        ),
        compiler_params=pltpu.CompilerParams(
            dimension_semantics=("parallel",),   # per-tile partials => megacore-shardable
            vmem_limit_bytes=vmem_limit,
        ),
    )(x, t2d)
    return -jnp.sum(partials)


def _reference(x, target):
    # Pure-JAX reference mirroring the PyTorch module exactly.
    c = x.shape[1]
    mask = jax.nn.one_hot(target, c, dtype=jnp.float32)
    xf = x.astype(jnp.float32)
    correct = jnp.sum(mask * xf, axis=1)
    wrong = jnp.max((1.0 - mask) * xf, axis=1)
    return -jnp.sum(jax.nn.relu(correct - wrong + 50.0))


if __name__ == "__main__":
    key = jax.random.PRNGKey(0)
    kx, kt, kx2, kt2, kx3, kt3 = jax.random.split(key, 6)

    # Case 1: small single-tile f32 (batch=8, classes=32).
    N, C = 8, 32
    x = jax.random.normal(kx, (N, C), dtype=jnp.float32) * 5.0
    target = jax.random.randint(kt, (N,), 0, C, dtype=jnp.int32)
    loss = jax.block_until_ready(carlini_wagner_loss(x, target))
    ref = _reference(x, target)
    assert jnp.allclose(loss, ref, rtol=1e-5, atol=1e-5), (loss, ref)

    # Case 2: multi-tile + ragged last tile + parallel per-tile partials
    # (batch=20, forced 8-row tiles => 3 grid steps, last one padded).
    N2, C2 = 20, 32
    x2 = jax.random.normal(kx2, (N2, C2), dtype=jnp.float32) * 5.0
    target2 = jax.random.randint(kt2, (N2,), 0, C2, dtype=jnp.int32)
    loss2 = jax.block_until_ready(carlini_wagner_loss(x2, target2, tile_rows=8))
    ref2 = _reference(x2, target2)
    assert jnp.allclose(loss2, ref2, rtol=1e-5, atol=1e-5), (loss2, ref2)

    # Case 3: bf16 native-dtype path with a non-128-multiple class count
    # (batch=24, classes=10) — exercises the 16-row sublane pack and the
    # lane-padding-aware VMEM accounting.
    N3, C3 = 24, 10
    x3 = (jax.random.normal(kx3, (N3, C3), dtype=jnp.float32) * 5.0).astype(jnp.bfloat16)
    target3 = jax.random.randint(kt3, (N3,), 0, C3, dtype=jnp.int32)
    loss3 = jax.block_until_ready(carlini_wagner_loss(x3, target3))
    ref3 = _reference(x3, target3)
    assert jnp.allclose(loss3, ref3, rtol=1e-3, atol=1e-3), (loss3, ref3)

    print("KERNEL_OK")
</pallas_src>

<mosaic_0001>
module attributes {stable_mosaic.version = 11 : i64} {
  func.func @_cw_loss_kernel(%arg0: i32, %arg1: memref<8x32xf32, #tpu.memory_space<vmem>>, %arg2: memref<8x1xi32, #tpu.memory_space<vmem>>, %arg3: memref<1x8x128xf32, #tpu.memory_space<vmem>>) attributes {dimension_semantics = [#tpu.dimension_semantics<parallel>], iteration_bounds = array<i64: 1>, scalar_prefetch = 0 : i64, scratch_operands = 0 : i64, tpu.core_type = #tpu.core_type<tc>, window_params = [{transform_indices = @transform_0, window_bounds = array<i64: 8, 32>}, {transform_indices = @transform_1, window_bounds = array<i64: 8, 1>}, {transform_indices = @transform_2, window_bounds = array<i64: 1, 8, 128>}]} {
    %c0 = arith.constant 0 : index
    %c0_0 = arith.constant 0 : index
    %0 = vector.load %arg1[%c0, %c0_0] : memref<8x32xf32, #tpu.memory_space<vmem>>, vector<8x32xf32>
    %c0_1 = arith.constant 0 : index
    %c0_2 = arith.constant 0 : index
    %1 = vector.load %arg2[%c0_1, %c0_2] : memref<8x1xi32, #tpu.memory_space<vmem>>, vector<8x1xi32>
    %2 = tpu.iota {dimensions = array<i32: 1>} : vector<8x32xi32>
    %3 = vector.broadcast %1 : vector<8x1xi32> to vector<8x32xi32>
    %4 = arith.cmpi eq, %2, %3 : vector<8x32xi32>
    %cst = arith.constant 0.000000e+00 : f32
    %5 = vector.broadcast %cst : f32 to vector<8x32xf32>
    %6 = arith.select %4, %0, %5 : vector<8x32xi1>, vector<8x32xf32>
    %cst_3 = arith.constant dense<0.000000e+00> : vector<8xf32>
    %7 = vector.multi_reduction <add>, %6, %cst_3 [1] : vector<8x32xf32> to vector<8xf32>
    %8 = vector.shape_cast %7 : vector<8xf32> to vector<8x1xf32>
    %cst_4 = arith.constant 0.000000e+00 : f32
    %9 = vector.broadcast %cst_4 : f32 to vector<8x32xf32>
    %10 = arith.select %4, %9, %0 : vector<8x32xi1>, vector<8x32xf32>
    %cst_5 = arith.constant dense<0xFF800000> : vector<8xf32>
    %11 = vector.multi_reduction <maximumf>, %10, %cst_5 [1] : vector<8x32xf32> to vector<8xf32>
    %12 = vector.shape_cast %11 : vector<8xf32> to vector<8x1xf32>
    %13 = arith.subf %8, %12 : vector<8x1xf32>
    %cst_6 = arith.constant 5.000000e+01 : f32
    %14 = vector.broadcast %cst_6 : f32 to vector<8x1xf32>
    %15 = arith.addf %13, %14 : vector<8x1xf32>
    %cst_7 = arith.constant 0.000000e+00 : f32
    %16 = vector.broadcast %cst_7 : f32 to vector<8x1xf32>
    %17 = arith.maximumf %15, %16 : vector<8x1xf32>
    %c8_i32 = arith.constant 8 : i32
    %18 = arith.muli %arg0, %c8_i32 : i32
    %19 = tpu.iota {dimensions = array<i32: 0>} : vector<8x1xi32>
    %20 = vector.broadcast %18 : i32 to vector<8x1xi32>
    %21 = arith.addi %20, %19 : vector<8x1xi32>
    %c8_i32_8 = arith.constant 8 : i32
    %22 = vector.broadcast %c8_i32_8 : i32 to vector<8x1xi32>
    %23 = arith.cmpi slt, %21, %22 : vector<8x1xi32>
    %cst_9 = arith.constant 0.000000e+00 : f32
    %24 = vector.broadcast %cst_9 : f32 to vector<8x1xf32>
    %25 = arith.select %23, %17, %24 : vector<8x1xi1>, vector<8x1xf32>
    %26 = vector.shape_cast %25 : vector<8x1xf32> to vector<1x8x1xf32>
    %cst_10 = arith.constant dense<0.000000e+00> : vector<1xf32>
    %27 = vector.multi_reduction <add>, %26, %cst_10 [1, 2] : vector<1x8x1xf32> to vector<1xf32>
    %28 = vector.shape_cast %27 : vector<1xf32> to vector<1x1x1xf32>
    %29 = vector.extract %28[0, 0, 0] : f32 from vector<1x1x1xf32>
    %30 = tpu.iota {dimensions = array<i32: 1>} : vector<1x8x128xi32>
    %31 = tpu.iota {dimensions = array<i32: 2>} : vector<1x8x128xi32>
    %c0_i32 = arith.constant 0 : i32
    %32 = vector.broadcast %c0_i32 : i32 to vector<1x8x128xi32>
    %33 = arith.cmpi eq, %30, %32 : vector<1x8x128xi32>
    %c0_i32_11 = arith.constant 0 : i32
    %34 = vector.broadcast %c0_i32_11 : i32 to vector<1x8x128xi32>
    %35 = arith.cmpi eq, %31, %34 : vector<1x8x128xi32>
    %36 = arith.andi %33, %35 : vector<1x8x128xi1>
    %cst_12 = arith.constant 0.000000e+00 : f32
    %37 = vector.broadcast %29 : f32 to vector<1x8x128xf32>
    %38 = vector.broadcast %cst_12 : f32 to vector<1x8x128xf32>
    %39 = arith.select %36, %37, %38 : vector<1x8x128xi1>, vector<1x8x128xf32>
    %c0_13 = arith.constant 0 : index
    %c0_14 = arith.constant 0 : index
    %c0_15 = arith.constant 0 : index
    %40 = vector.load %arg3[%c0_13, %c0_14, %c0_15] : memref<1x8x128xf32, #tpu.memory_space<vmem>>, vector<1x8x128xf32>
    tpu.vector_store %arg3[%c0_13, %c0_14, %c0_15], %39 {strides = array<i32>} : memref<1x8x128xf32, #tpu.memory_space<vmem>>, vector<1x8x128xf32>,
    return
  }
  func.func @transform_0(%arg0: i32) -> (i32, i32) {
    %c0_i32 = arith.constant 0 : i32
    %c0_i32_0 = arith.constant 0 : i32
    return %arg0, %c0_i32 : i32, i32
  }
  func.func @transform_1(%arg0: i32) -> (i32, i32) {
    %c0_i32 = arith.constant 0 : i32
    %c0_i32_0 = arith.constant 0 : i32
    return %arg0, %c0_i32 : i32, i32
  }
  func.func @transform_2(%arg0: i32) -> (i32, i32, i32) {
    %c0_i32 = arith.constant 0 : i32
    %c0_i32_0 = arith.constant 0 : i32
    %c0_i32_1 = arith.constant 0 : i32
    return %arg0, %c0_i32, %c0_i32_0 : i32, i32, i32
  }
}

</mosaic_0001>

<bundles_post_ra>
// kernel: tpu_custom_call.1
= control target key start
LH: loop header
LB: loop body
LE: loop exit
PB: predicated region body
PF: predicated region fallthrough
CT: control target
= control target key end

     0   :  { %s129_s0 = inlined_call_operand.vmem [shape: f32[8,32], index: 0, kind: input, shape index: {}]   ;;  %s130_s1 = inlined_call_operand.vmem [shape: s32[8,1], index: 1, kind: input, shape index: {}]   ;;  %s131_s2 = inlined_call_operand.hbm [shape: f32[1,8,128], index: 2, kind: output, shape index: {}]  }
   0x1   :  { %v13_v0 = vld [vmem:[%s130_s1] sm:$0xff] }
   0x2   :  { %7 = vsyncpa [#allocation3], 0  ;;  %v103_v1 = vmov 0   ;;  %v14_v2 = vlaneseq  ;;  %v12_v4 = vld [vmem:[%s129_s0] sm:$0xff]  ;;  %vm21_vm0 = vcmask 261120   ;;  %vm39_vm2 = vcmask 7168  }
   0x3   :  { %76 = vset.pattern.permute.xlu0 %v103_v1  ;;  %s104_s0 = smov [#allocation2]   ;;  %s63_s15 = sshll.u32 %s131_s2, 4  ;;  %s64_s15 = int_to_ptr.hbm [resolvable:$true] %s63_s15 }
   0x4   :  { %17 = vperm.xlu0 %76, %v13_v0   ;;  %v15_v3 = vand.u32 127, %v14_v2  ;;  %v34_v23 = vshrl.u32 %v14_v2, 7  ;;  %s61_s1 = sshll.u32 %s104_s0, 4  ;;  %s62_s1 = int_to_ptr.vmem [resolvable:$true] %s61_s1 }
   0x6   :  { %vm50_vm3 = vcmp.eq.s32.totalorder %v34_v23, 0  ;;  %vm51_vm4 = vcmp.eq.s32.totalorder %v15_v3, 0 }
   0x7   :  { %vm52_vm5 = vmand %vm50_vm3, %vm51_vm4 }
  0x76   :  { %v18_v5 = vpop.permute.xlu0 %17 }
  0x77   :  { %vm19_vm1 = vcmp.eq.s32.totalorder %v15_v3, %v18_v5 }
  0x78   :  { %v25_v6 = vsel %vm19_vm1, 0.0, %v12_v4  ;;  %v20_v7 = vsel %vm19_vm1, %v12_v4, 0.0 }
  0x79   :  { %v26_v8 = vsel %vm21_vm0, %v25_v6, -inf  ;;  %v22_v9 = vsel %vm21_vm0, %v20_v7, 0.0 }
  0x7a   :  { %27 = vmax.xlane.f32.xlu1 %v26_v8  ;;  %23 = vadd.xlane.f32.xlu0 %v22_v9 }
  0xed   :  { %v28_v10 = vpop.xlane.xlu1 %27  ;;  %v24_v11 = vpop.xlane.xlu0 %23 }
  0xee   :  { %v29_v12 = vsub.f32 %v24_v11, %v28_v10 }
  0xf0   :  { %v30_v13 = vadd.f32 50.0, %v29_v12 }
  0xf2   :  { %v31_v14 = vmax.f32 %v30_v13, 0.0 }
  0xf4   :  { %v40_v15 = vsel %vm39_vm2, %v31_v14, 0.0 }
  0xf5   :  { %41 = vadd.xlane.f32.xlu1 %v40_v15 }
 0x168   :  { %v42_v16 = vpop.xlane.xlu1 %41 }
 0x169   :  { %v43_v17 = vrot.slane %v42_v16, 4 }
 0x16b   :  { %v44_v18 = vadd.f32 %v43_v17, %v42_v16 }
 0x16d   :  { %v45_v19 = vrot.slane %v44_v18, 2 }
 0x16f   :  { %v46_v20 = vadd.f32 %v45_v19, %v44_v18 }
 0x171   :  { %v47_v21 = vrot.slane %v46_v20, 1 }
 0x173   :  { %v48_v22 = vadd.f32 %v47_v21, %v46_v20 }
 0x175   :  { %72 = vpush %v48_v22 }
 0x1a6   :  { %s73_s16 = spop %72 }
 0x1a7   :  { %v53_v24 = vstv %s73_s16 }
 0x1a8   :  { %v54_v25 = vsel %vm52_vm5, %v53_v24, 0.0 }
 0x1a9   :  { %55 = vst [vmem:[#allocation2] sm:$0xff] %v54_v25 }
 0x1aa   :  { %66 = dma.vmem_to_hbm [thread:$0]  %s62_s1, 128, %s64_s15, [#allocation3]  }
 0x1ab   :  { %101 = dma.done.wait [#allocation3], 128  }
 0x1ac   :  { %102 = vsyncadd [#allocation3], 4294967168 }
 0x1ad   :  { %71 = vsyncpa [#allocation3], 1 }

</bundles_post_ra>
